<compile_context>
chip_gen: v7x
topology: tpu7x:2x2x1
jax: 0.10.0
libtpu: 0.0.40
codegen_flags: <defaults>
</compile_context>

<pallas_src>
import math

import jax
import jax.numpy as jnp
from jax.experimental import pallas as pl
from jax.experimental.pallas import tpu as pltpu


def _round_up(x, m):
    return ((x + m - 1) // m) * m


def _linear_kernel(x_ref, w_ref, b_ref, o_ref):
    # x_ref: (TM, K)    f32 rows of the flattened (batch*seq) input (streamed per tile)
    # w_ref: (K, N_pad) f32 projection weight (pre-transposed, lane-padded, VMEM-resident)
    # b_ref: (1, N_pad) f32 bias (VMEM-resident)
    # o_ref: (TM, N_pad) f32 lane-dense output tile
    acc = jnp.dot(
        x_ref[...],
        w_ref[...],
        preferred_element_type=jnp.float32,
        precision=jax.lax.Precision.HIGHEST,
    )
    o_ref[...] = (acc + b_ref[...]).astype(o_ref.dtype)


def linear_projection_pallas(x_flat, w_kn, b_pad, *, out_dtype=jnp.float32, tm=1024):
    """x_flat: (M, K) f32   w_kn: (K, N_pad) f32   b_pad: (1, N_pad) f32 -> (M, N_pad)."""
    M, K = x_flat.shape
    Kw, N_pad = w_kn.shape
    assert Kw == K and N_pad % 128 == 0

    # Row tile: TM rows per grid step (multiple of 8 for sublane alignment).
    if M >= tm:
        TM = tm
    else:
        TM = max(8, _round_up(M, 8))
    M_pad = _round_up(M, TM)
    if M_pad != M:
        x_flat = jnp.pad(x_flat, ((0, M_pad - M), (0, 0)))
    grid = (M_pad // TM,)

    out = pl.pallas_call(
        _linear_kernel,
        out_shape=jax.ShapeDtypeStruct((M_pad, N_pad), out_dtype),
        grid_spec=pltpu.PrefetchScalarGridSpec(
            num_scalar_prefetch=0,
            grid=grid,
            in_specs=[
                pl.BlockSpec((TM, K), lambda i: (i, 0)),       # x: streamed per tile
                pl.BlockSpec((K, N_pad), lambda i: (0, 0)),    # weight: VMEM-resident
                pl.BlockSpec((1, N_pad), lambda i: (0, 0)),    # bias:   VMEM-resident
            ],
            out_specs=pl.BlockSpec((TM, N_pad), lambda i: (i, 0)),
        ),
        compiler_params=pltpu.CompilerParams(
            dimension_semantics=("parallel",),                 # megacore-shard M on v7x
            vmem_limit_bytes=32 * 1024 * 1024,                 # explicit; well inside limits
        ),
    )(x_flat, w_kn, b_pad)
    return out[:M]


class TimeSeriesTransformerPallas:
    """JAX/Pallas port of the PyTorch TimeSeriesTransformer (a per-timestep Linear)."""

    def __init__(self, input_dim, feature_dim=250, key=None, pallas_min_rows=0):
        self.input_dim = input_dim
        self.feature_dim = feature_dim
        self.pallas_min_rows = pallas_min_rows
        if key is None:
            key = jax.random.PRNGKey(0)
        k_w, k_b = jax.random.split(key)
        # Deterministic init mimicking nn.Linear: U(-1/sqrt(fan_in), 1/sqrt(fan_in)).
        bound = 1.0 / math.sqrt(input_dim)
        self.weight = jax.random.uniform(
            k_w, (feature_dim, input_dim), jnp.float32, -bound, bound
        )
        self.bias = jax.random.uniform(
            k_b, (feature_dim,), jnp.float32, -bound, bound
        )
        # Lane-pad N -> multiple of 128 and transpose ONCE at init (no per-call copies).
        self.n_pad = _round_up(feature_dim, 128)
        self.w_kn = jnp.pad(
            self.weight, ((0, self.n_pad - feature_dim), (0, 0))
        ).T  # (K, N_pad) f32 — exact nn.Linear semantics
        self.b_pad = jnp.pad(self.bias, (0, self.n_pad - feature_dim)).reshape(
            1, self.n_pad
        )  # (1, N_pad) f32

    def __call__(self, x):
        batch_size, seq_len, _ = x.shape
        M = batch_size * seq_len
        x_flat = x.reshape(M, self.input_dim)
        if M < self.pallas_min_rows:
            # Tiny-M fallback: a fused XLA dot+bias beats the custom-call overhead.
            y = x_flat @ self.weight.T + self.bias
        else:
            y_pad = linear_projection_pallas(
                x_flat, self.w_kn, self.b_pad, out_dtype=jnp.float32
            )
            y = y_pad[:, : self.feature_dim]
        return y.reshape(batch_size, seq_len, self.feature_dim)


if __name__ == "__main__":
    key = jax.random.PRNGKey(0)
    k_x, k_p = jax.random.split(key)

    batch, seq_len, input_dim, feature_dim = 2, 8, 16, 250
    x = jax.random.normal(k_x, (batch, seq_len, input_dim), jnp.float32)

    model = TimeSeriesTransformerPallas(input_dim, feature_dim, key=k_p)
    out = model(x)
    out = jax.block_until_ready(out)
    assert out.shape == (batch, seq_len, feature_dim)

    # Tight check against the pure-f32 PyTorch-equivalent forward (kernel now keeps
    # f32 operands + HIGHEST matmul precision, so this should match closely).
    x_flat = x.reshape(-1, input_dim)
    ref_f32 = (
        jnp.dot(x_flat, model.weight.T, precision=jax.lax.Precision.HIGHEST)
        + model.bias
    ).reshape(batch, seq_len, feature_dim)
    assert jnp.allclose(out, ref_f32, atol=1e-4, rtol=1e-4), (
        float(jnp.max(jnp.abs(out - ref_f32)))
    )

    print("KERNEL_OK")
</pallas_src>

<mosaic_0001>
module attributes {stable_mosaic.version = 11 : i64} {
  func.func @_linear_kernel(%arg0: i32, %arg1: memref<16x16xf32, #tpu.memory_space<vmem>>, %arg2: memref<16x256xf32, #tpu.memory_space<vmem>>, %arg3: memref<1x256xf32, #tpu.memory_space<vmem>>, %arg4: memref<16x256xf32, #tpu.memory_space<vmem>>) attributes {dimension_semantics = [#tpu.dimension_semantics<parallel>], iteration_bounds = array<i64: 1>, scalar_prefetch = 0 : i64, scratch_operands = 0 : i64, tpu.core_type = #tpu.core_type<tc>, window_params = [{transform_indices = @transform_0, window_bounds = array<i64: 16, 16>}, {pipeline_mode = #tpu.pipeline_mode<synchronous>, transform_indices = @transform_1, window_bounds = array<i64: 16, 256>}, {pipeline_mode = #tpu.pipeline_mode<synchronous>, transform_indices = @transform_2, window_bounds = array<i64: 1, 256>}, {transform_indices = @transform_3, window_bounds = array<i64: 16, 256>}]} {
    %c0 = arith.constant 0 : index
    %c0_0 = arith.constant 0 : index
    %0 = vector.load %arg1[%c0, %c0_0] : memref<16x16xf32, #tpu.memory_space<vmem>>, vector<16x16xf32>
    %c0_1 = arith.constant 0 : index
    %c0_2 = arith.constant 0 : index
    %1 = vector.load %arg2[%c0_1, %c0_2] : memref<16x256xf32, #tpu.memory_space<vmem>>, vector<16x256xf32>
    %cst = arith.constant dense<0.000000e+00> : vector<16x256xf32>
    %2 = tpu.matmul %0, %1, %cst {dimension_numbers = #tpu.dot_dimension_numbers<[1], [0], [0], [1], [0, 0, 1, 1], [], []>, precision = #tpu.contract_precision<fp32>} : vector<16x16xf32>, vector<16x256xf32>, vector<16x256xf32> -> vector<16x256xf32>
    %c0_3 = arith.constant 0 : index
    %c0_4 = arith.constant 0 : index
    %3 = vector.load %arg3[%c0_3, %c0_4] : memref<1x256xf32, #tpu.memory_space<vmem>>, vector<1x256xf32>
    %4 = vector.broadcast %3 : vector<1x256xf32> to vector<16x256xf32>
    %5 = arith.addf %2, %4 : vector<16x256xf32>
    %c0_5 = arith.constant 0 : index
    %c0_6 = arith.constant 0 : index
    %6 = vector.load %arg4[%c0_5, %c0_6] : memref<16x256xf32, #tpu.memory_space<vmem>>, vector<16x256xf32>
    tpu.vector_store %arg4[%c0_5, %c0_6], %5 {strides = array<i32>} : memref<16x256xf32, #tpu.memory_space<vmem>>, vector<16x256xf32>,
    return
  }
  func.func @transform_0(%arg0: i32) -> (i32, i32) {
    %c0_i32 = arith.constant 0 : i32
    %c0_i32_0 = arith.constant 0 : i32
    return %arg0, %c0_i32 : i32, i32
  }
  func.func @transform_1(%arg0: i32) -> (i32, i32) {
    %c0_i32 = arith.constant 0 : i32
    %c0_i32_0 = arith.constant 0 : i32
    %c0_i32_1 = arith.constant 0 : i32
    return %c0_i32, %c0_i32_0 : i32, i32
  }
  func.func @transform_2(%arg0: i32) -> (i32, i32) {
    %c0_i32 = arith.constant 0 : i32
    %c0_i32_0 = arith.constant 0 : i32
    %c0_i32_1 = arith.constant 0 : i32
    return %c0_i32, %c0_i32_0 : i32, i32
  }
  func.func @transform_3(%arg0: i32) -> (i32, i32) {
    %c0_i32 = arith.constant 0 : i32
    %c0_i32_0 = arith.constant 0 : i32
    return %arg0, %c0_i32 : i32, i32
  }
}

</mosaic_0001>

<bundles_post_ra>
// kernel: tpu_custom_call.1
= control target key start
LH: loop header
LB: loop body
LE: loop exit
PB: predicated region body
PF: predicated region fallthrough
CT: control target
= control target key end

     0   :  { %8 = vsyncpa [#allocation3], 0  ;;  %s843_s0 = inlined_call_operand.hbm [shape: f32[16,16], index: 0, kind: input, shape index: {}]   ;;  %s844_s1 = inlined_call_operand.hbm [shape: f32[16,256], index: 1, kind: input, shape index: {}]   ;;  %s845_s2 = inlined_call_operand.vmem [shape: f32[1,256], index: 2, kind: input, shape index: {}]   ;;  %s846_s3 = inlined_call_operand.hbm [shape: f32[16,256], index: 3, kind: output, shape index: {}]  }
   0x1   :  { %9 = vsyncpa [#allocation6], 0 }
   0x2   :  { %10 = vsyncpa [#allocation4], 0  ;;  %s758_s12 = smov [#allocation2]   ;;  %s686_s16 = scalar_lea.hbm %s843_s0, 256 }
   0x3   :  { %s16_s13 = sshll.u32 %s758_s12, 4  ;;  %p687_p0 = scmp.ne.s32.totalorder %s843_s0, %s686_s16  ;;  %s17_s13 = int_to_ptr.vmem [resolvable:$true] %s16_s13 }
   0x4   :  { %p690_p1 = scmp.lt.u32.totalorder %s686_s16, %s843_s0 }
   0x6   :  { %p692_p2 = pnand %p690_p1, %p687_p0 }
   0x8   :  { %695 = shalt.err (!%p692_p2)
}
   0x9   :  { %s696_s21 = scalar_lea.vmem %s17_s13, 256  ;;  %p701_p4 = scmp.lt.s32.totalorder %s17_s13, %s17_s13 }
   0xa   :  { %p697_p3 = scmp.ne.s32.totalorder %s17_s13, %s696_s21  ;;  %p702_p5 = scmp.lt.s32.totalorder %s696_s21, %s696_s21 }
   0xc   :  { %p703_p6 = por %p702_p5, %p701_p4 }
   0xe   :  { %p704_p7 = pnand %p703_p6, %p697_p3 }
  0x10   :  { %707 = shalt.err (!%p704_p7)
}
  0x11   :  { %s759_s22 = smov 128   ;;  %s760_s23 = smov 8  }
  0x12   :  { %22 = dma.hbm_to_vmem [thread:$0]  %s843_s0, 256, %s17_s13, [#allocation3], %s759_s22, %s759_s22, %s760_s23  }
  0x13   :  { %s761_s26 = smov [#allocation5]   ;;  %s708_s30 = scalar_lea.hbm %s844_s1, 512 }
  0x14   :  { %s28_s27 = sshll.u32 %s761_s26, 4  ;;  %p709_p8 = scmp.ne.s32.totalorder %s844_s1, %s708_s30  ;;  %s29_s27 = int_to_ptr.vmem [resolvable:$true] %s28_s27 }
  0x15   :  { %p712_p9 = scmp.lt.u32.totalorder %s708_s30, %s844_s1 }
  0x17   :  { %p714_p10 = pnand %p712_p9, %p709_p8 }
  0x19   :  { %717 = shalt.err (!%p714_p10)
}
  0x1a   :  { %s718_s8 = scalar_lea.vmem %s29_s27, 512  ;;  %p723_p12 = scmp.lt.s32.totalorder %s29_s27, %s29_s27 }
  0x1b   :  { %p719_p11 = scmp.ne.s32.totalorder %s29_s27, %s718_s8  ;;  %p724_p13 = scmp.lt.s32.totalorder %s718_s8, %s718_s8 }
  0x1d   :  { %p725_p0 = por %p724_p13, %p723_p12 }
  0x1f   :  { %p726_p1 = pnand %p725_p0, %p719_p11 }
  0x21   :  { %729 = shalt.err (!%p726_p1)
}
  0x22   :  { %s762_s0 = smov 256   ;;  %s763_s9 = smov 16  }
  0x23   :  { %34 = dma.hbm_to_vmem [thread:$0]  %s844_s1, 512, %s29_s27, [#allocation6], %s762_s0, %s762_s0, %s763_s9  }
  0x24   :  { %752 = dma.done.wait [#allocation3], 256  }
  0x25   :  { %753 = vsyncadd [#allocation3], 4294967040 }
  0x26   :  { %754 = dma.done.wait [#allocation6], 512  }
  0x27   :  { %755 = vsyncadd [#allocation6], 4294966784  ;;  %v764_v0 = vmov 0.0   ;;  %vm61_vm0 = vcmask 130048   ;;  %v46_v1 = vld [vmem:[#allocation5 + $0x8] sm:$0xff]  ;;  %v48_v2 = vld [vmem:[#allocation5 + $0x18] sm:$0xff]  ;;  %v51_v47 = vlaneseq }
  0x28   :  { %415 = vmatprep.mubr.f32.mxu0 %v764_v0  ;;  %136 = vmatprep.mubr.f32.mxu1 %v764_v0  ;;  %v45_v3 = vld [vmem:[#allocation5] sm:$0xff]  ;;  %v68_v4 = vand.u32 4294901760, %v46_v1  ;;  %v72_v5 = vand.u32 4294901760, %v48_v2  ;;  %v47_v6 = vld [vmem:[#allocation5 + $0x10] sm:$0xff]  ;;  %v44_v9 = vld [vmem:[#allocation2 + $0x8] sm:$0xff]  ;;  %s765_s13 = smov [#allocation7]  }
  0x29   :  { %v70_v7 = vand.u32 4294901760, %v45_v3  ;;  %v43_v8 = vld [vmem:[#allocation2] sm:$0xff]  ;;  %v74_v10 = vand.u32 4294901760, %v47_v6  ;;  %v66_v12 = vsel %vm61_vm0, %v44_v9, 0  ;;  %v52_v48 = vshrl.u32 %v51_v47, 7  ;;  %s617_s14 = sshll.u32 %s765_s13, 4  ;;  %s618_s14 = int_to_ptr.vmem [resolvable:$true] %s617_s14 }
  0x2a   :  { %v63_v11 = vsel %vm61_vm0, %v43_v8, 0  ;;  %v630_v13 = vpack.c.bf16 %v72_v5, %v68_v4  ;;  %v160_v14 = vsub.f32 %v46_v1, %v68_v4  ;;  %v172_v15 = vsub.f32 %v48_v2, %v72_v5  ;;  %v49_v50 = vld [vmem:[%s845_s2] sm:$0x3]  ;;  %s730_s2 = scalar_lea.vmem %s618_s14, 512  ;;  %p735_p3 = scmp.lt.s32.totalorder %s618_s14, %s618_s14 }
  0x2b   :  { %v166_v16 = vsub.f32 %v45_v3, %v70_v7  ;;  %v632_v17 = vpack.c.bf16 %v74_v10, %v70_v7  ;;  %v178_v18 = vsub.f32 %v47_v6, %v74_v10  ;;  %v137_v19 = vand.u32 4294901760, %v63_v11  ;;  %p731_p2 = scmp.ne.s32.totalorder %s618_s14, %s730_s2  ;;  %p736_p4 = scmp.lt.s32.totalorder %s730_s2, %s730_s2 }
  0x2c   :  { %v148_v20 = vand.u32 4294901760, %v66_v12  ;;  %643 = vmatprep.subr.bf16.mxu0 %v630_v13  ;;  %631 = vmatprep.subr.bf16.mxu1 %v630_v13  ;;  %v161_v21 = vand.u32 4294901760, %v160_v14  ;;  %v173_v22 = vand.u32 4294901760, %v172_v15  ;;  %v638_v44 = vpack.c.bf16 %v172_v15, %v160_v14 }
  0x2d   :  { %v167_v23 = vand.u32 4294901760, %v166_v16  ;;  %645 = vmatpush1.bf16.msra.mxu0 %v632_v17  ;;  %633 = vmatpush1.bf16.msra.mxu1 %v632_v17  ;;  %v138_v24 = vsub.f32 %v63_v11, %v137_v19  ;;  %v179_v26 = vand.u32 4294901760, %v178_v18  ;;  %v640_v46 = vpack.c.bf16 %v178_v18, %v166_v16  ;;  %p737_p5 = por %p736_p4, %p735_p3 }
  0x2e   :  { %v149_v25 = vsub.f32 %v66_v12, %v148_v20  ;;  %v162_v27 = vsub.f32 %v160_v14, %v161_v21  ;;  %v174_v28 = vsub.f32 %v172_v15, %v173_v22  ;;  %v646_v29 = vpack.c.bf16 %v173_v22, %v161_v21 }
  0x2f   :  { %v168_v30 = vsub.f32 %v166_v16, %v167_v23  ;;  %v139_v31 = vand.u32 4294901760, %v138_v24  ;;  %v180_v33 = vsub.f32 %v178_v18, %v179_v26  ;;  %v648_v34 = vpack.c.bf16 %v179_v26, %v167_v23  ;;  %p738_p6 = pnand %p737_p5, %p731_p2 }
  0x30   :  { %v150_v32 = vand.u32 4294901760, %v149_v25  ;;  %v163_v35 = vand.u32 4294901760, %v162_v27  ;;  %v175_v36 = vand.u32 4294901760, %v174_v28  ;;  %647 = vmatprep.subr.bf16.mxu0 %v646_v29  ;;  %v53_v49 = vsub.s32 0, %v52_v48 }
  0x31   :  { %v169_v37 = vand.u32 4294901760, %v168_v30  ;;  %419 = vmatmul.mubr.f32.vlgmr.msra.gmra.mrb[0].mxu0 %v139_v31  ;;  %v140_v38 = vsub.f32 %v138_v24, %v139_v31  ;;  %v181_v39 = vand.u32 4294901760, %v180_v33  ;;  %v57_v51 = vsub.s32 1, %v52_v48 }
  0x32   :  { %v151_v40 = vsub.f32 %v149_v25, %v150_v32  ;;  %424 = vmatprep.mubr.f32.mxu0 %v764_v0  ;;  %v634_v41 = vpack.c.bf16 %v175_v36, %v163_v35  ;;  %649 = vmatpush1.bf16.msra.mxu0 %v648_v34  ;;  %v54_v54 = vrot.slane %v49_v50, %v53_v49 }
  0x33   :  { %v141_v42 = vand.u32 4294901760, %v140_v38  ;;  %v636_v43 = vpack.c.bf16 %v181_v39, %v169_v37  ;;  %651 = vmatprep.subr.bf16.mxu0 %v630_v13  ;;  %v58_v55 = vrot.slane %v49_v50, %v57_v51 }
  0x34   :  { %635 = vmatprep.subr.bf16.mxu1 %v634_v41  ;;  %v152_v45 = vand.u32 4294901760, %v151_v40 }
  0x35   :  { %142 = vmatmul.mubr.f32.vlgmr.msra.gmra.mrb[0].mxu1 %v141_v42  ;;  %428 = vmatmul.mubr.f32.gmra.mrb[2].mxu0 %v150_v32 }
  0x36   :  { %637 = vmatpush1.bf16.msra.mxu1 %v636_v43  ;;  %147 = vmatprep.mubr.f32.mxu1 %v764_v0 }
  0x37   :  { %510 = vmatprep.mubr.f32.mxu0 %v764_v0  ;;  %639 = vmatprep.subr.bf16.mxu1 %v638_v44 }
  0x39   :  { %153 = vmatmul.mubr.f32.gmra.mrb[2].mxu1 %v152_v45  ;;  %512 = vmatmul.mubr.f32.vlgmr.msra.gmra.mrb[0].mxu0 %v137_v19 }
  0x3a   :  { %243 = vmatprep.mubr.f32.mxu1 %v764_v0  ;;  %517 = vmatprep.mubr.f32.mxu0 %v764_v0 }
  0x3b   :  { %653 = vmatpush1.bf16.msra.mxu0 %v632_v17 }
  0x3d   :  { %245 = vmatmul.mubr.f32.vlgmr.msra.gmra.mrb[0].mxu1 %v137_v19  ;;  %519 = vmatmul.mubr.f32.gmra.mrb[2].mxu0 %v148_v20 }
  0x3e   :  { %641 = vmatpush1.bf16.msra.mxu1 %v640_v46  ;;  %250 = vmatprep.mubr.f32.mxu1 %v764_v0 }
  0x3f   :  { %593 = vmatprep.mubr.f32.mxu0 %v764_v0 }
  0x41   :  { %252 = vmatmul.mubr.f32.gmra.mrb[2].mxu1 %v148_v20  ;;  %595 = vmatmul.mubr.f32.vlgmr.msra.gmra.mrb[0].mxu0 %v137_v19 }
  0x42   :  { %330 = vmatprep.mubr.f32.mxu1 %v764_v0  ;;  %600 = vmatprep.mubr.f32.mxu0 %v764_v0 }
  0x45   :  { %333 = vmatmul.mubr.f32.vlgmr.msra.gmra.mrb[0].mxu1 %v138_v24  ;;  %602 = vmatmul.mubr.f32.gmra.mrb[2].mxu0 %v148_v20 }
  0x46   :  { %338 = vmatprep.mubr.f32.mxu1 %v764_v0 }
  0x49   :  { %341 = vmatmul.mubr.f32.gmra.mrb[2].mxu1 %v149_v25 }
 0x114   :  { %v596_v52 = vpop.f32.mrb[0].mxu0 }
 0x115   :  { %v598_v53 = vpop.f32.mrb[1].mxu0 }
 0x118   :  { %v334_v56 = vpop.f32.mrb[0].mxu1  ;;  %v603_v57 = vpop.f32.mrb[2].mxu0 }
 0x119   :  { %v654_v58 = vadd.f32 %v334_v56, %v54_v54  ;;  %v336_v59 = vpop.f32.mrb[1].mxu1  ;;  %v605_v60 = vpop.f32.mrb[3].mxu0 }
 0x11a   :  { %v656_v61 = vadd.f32 %v336_v59, %v58_v55 }
 0x11b   :  { %v655_v62 = vadd.f32 %v654_v58, %v596_v52 }
 0x11c   :  { %v657_v63 = vadd.f32 %v656_v61, %v598_v53  ;;  %v342_v0 = vpop.f32.mrb[2].mxu1 }
 0x11d   :  { %608 = vst [vmem:[#allocation7] sm:$0xff] %v655_v62  ;;  %v658_v1 = vadd.f32 %v342_v0, %v54_v54  ;;  %v344_v2 = vpop.f32.mrb[3].mxu1 }
 0x11e   :  { %609 = vst [vmem:[#allocation7 + $0x8] sm:$0xff] %v657_v63  ;;  %v660_v3 = vadd.f32 %v344_v2, %v58_v55 }
 0x11f   :  { %v659_v4 = vadd.f32 %v658_v1, %v603_v57 }
 0x120   :  { %v661_v5 = vadd.f32 %v660_v3, %v605_v60 }
 0x121   :  { %610 = vst [vmem:[#allocation7 + $0x10] sm:$0xff] %v659_v4 }
 0x122   :  { %611 = vst [vmem:[#allocation7 + $0x18] sm:$0xff] %v661_v5 }
 0x123   :  { %741 = shalt.err (!%p738_p6)
}
 0x124   :  { %s742_s17 = scalar_lea.hbm %s846_s3, 512 }
 0x125   :  { %p743_p7 = scmp.ne.s32.totalorder %s846_s3, %s742_s17  ;;  %p746_p8 = scmp.lt.u32.totalorder %s742_s17, %s846_s3 }
 0x127   :  { %p748_p9 = pnand %p746_p8, %p743_p7 }
 0x129   :  { %751 = shalt.err (!%p748_p9)
}
 0x12a   :  { %623 = dma.vmem_to_hbm [thread:$0]  %s618_s14, 512, %s846_s3, [#allocation4], %s762_s0, %s762_s0, %s763_s9  }
 0x12b   :  { %756 = dma.done.wait [#allocation4], 512  }
 0x12c   :  { %757 = vsyncadd [#allocation4], 4294966784 }
 0x12d   :  { %627 = vsyncpa [#allocation3], 1 }
 0x12e   :  { %628 = vsyncpa [#allocation6], 1 }
 0x12f   :  { %629 = vsyncpa [#allocation4], 1 }

</bundles_post_ra>
